<compile_context>
chip_gen: v7x
topology: tpu7x:2x2x1
jax: 0.10.0
libtpu: 0.0.40
codegen_flags: <defaults>
</compile_context>

<pallas_src>
import functools

import jax
import jax.numpy as jnp
from jax.experimental import pallas as pl
from jax.experimental.pallas import tpu as pltpu

AFFINE_EPS = 1e-4
N_HIDDEN_LAYERS = 4
HIDDEN_CHANNELS = 32
IN_CHANNELS_RRDB = 2


def _affine_kernel(x_ref, ft_ref, w0_ref, wh_ref, wo_ref, b_ref,
                   z_ref, ld_ref, *, c1, c2, n_hidden, reverse):
    """Grid cell (n, j): one spatial tile of one sample.

    x_ref  : (1, C, Pt) f32       full z block; rows [:c1]=z1, rows [c1:]=z2
    ft_ref : (1, Crrdb, Pt) f32   rrdb conditioning features
    w0_ref : (H, c1+Crrdb) bf16   first-layer weight, stored (out, in)
    wh_ref : (n_hidden, H, H) bf16  hidden-layer weights, stored (out, in)
    wo_ref : (2*c2, H) bf16       rows [:c2]=shift (even out-ch), [c2:]=scale (odd)
    b_ref  : (H, 8) f32           col l (l<=4): bias of layer l;
                                  col 5 / 6: shift / scale bias in first c2 rows
    z_ref  : (1, C, Pt) f32       full output block (z1 copied through)
    ld_ref : (1, 1, Pt) f32       per-lane log(scale) partials for this tile
    """
    x = x_ref[0]                                   # (C, Pt) f32
    z1 = x[:c1]                                    # (c1, Pt) f32
    z2 = x[c1:]                                    # (c2, Pt) f32
    ft = ft_ref[0]                                 # (Crrdb, Pt) f32

    b = b_ref[...]                                 # (H, 8) f32
    w0 = w0_ref[...]                               # (H, c1+Crrdb) bf16

    z1b = z1.astype(jnp.bfloat16)
    ftb = ft.astype(jnp.bfloat16)

    # Layer 0: Linear on cat([z1, ft], channel dim) as two bf16 dots folded
    # into one f32 accumulation (no concat; MRB-fusable on v7x).
    h = (jnp.dot(w0[:, :c1], z1b, preferred_element_type=jnp.float32)
         + jnp.dot(w0[:, c1:], ftb, preferred_element_type=jnp.float32)
         + b[:, 0:1])
    h = jnp.maximum(h, 0.0)

    # n_hidden x (Linear(H, H) + ReLU); bf16 operands, f32 accumulate.
    for l in range(n_hidden):
        hb = h.astype(jnp.bfloat16)
        h = jnp.dot(wh_ref[l], hb, preferred_element_type=jnp.float32) + b[:, l + 1:l + 2]
        h = jnp.maximum(h, 0.0)

    # Fused final Linear(H, 2*c2): one dot, shift/scale via static row slices.
    hb = h.astype(jnp.bfloat16)
    ss = jnp.dot(wo_ref[...], hb, preferred_element_type=jnp.float32)   # (2*c2, Pt)
    shift = ss[:c2] + b[:c2, 5:6]
    scale = jax.nn.sigmoid(ss[c2:] + b[:c2, 6:7] + 2.0) + AFFINE_EPS

    if reverse:
        # Exact divide keeps bit-level invertibility of the flow.
        z2_new = z2 / scale - shift
    else:
        z2_new = (z2 + shift) * scale

    z_ref[0, :c1, :] = z1                          # pass-through half
    z_ref[0, c1:, :] = z2_new                      # transformed half

    # Per-tile lane-wide log(scale) partials (reduced over lanes/tiles in the
    # wrapper); the c2-sublane reduce rides the otherwise-idle XLU slot.
    ld_ref[0] = jnp.sum(jnp.log(scale), axis=0, keepdims=True)


def _pick_p_tile(p):
    """Largest lane tile (multiple of 128) dividing P, else the whole extent."""
    for t in (8192, 4096, 2048, 1024, 512, 256, 128):
        if p % t == 0:
            return t
    return p


def init_faffine_params(key, in_channels=4, in_channels_rrdb=IN_CHANNELS_RRDB,
                        hidden_channels=HIDDEN_CHANNELS,
                        n_hidden_layers=N_HIDDEN_LAYERS):
    """nn.Linear-style init (uniform +/- 1/sqrt(fan_in)); weights stored (out, in)."""
    c1 = in_channels // 2
    c2 = in_channels - c1
    sizes = ([(c1 + in_channels_rrdb, hidden_channels)]
             + [(hidden_channels, hidden_channels)] * n_hidden_layers
             + [(hidden_channels, 2 * c2)])
    params = []
    for fan_in, fan_out in sizes:
        key, kw, kb = jax.random.split(key, 3)
        bound = 1.0 / jnp.sqrt(jnp.float32(fan_in))
        w = jax.random.uniform(kw, (fan_out, fan_in), jnp.float32, -bound, bound)
        b = jax.random.uniform(kb, (fan_out,), jnp.float32, -bound, bound)
        params.append((w, b))
    return params


@functools.partial(jax.jit, static_argnames=("reverse",))
def cond_affine_separated_and_cond_2dtoy(x, ft, logdet, params, reverse=False):
    """Forward of CondAffineSeparatedAndCond2dToy.

    x      : (N, C, H, W)  flow input `z` (NCHW, like PyTorch)
    ft     : (N, 2, H, W)  rrdb features (in_channels_rrdb = 2)
    logdet : (N,)
    Returns (output NCHW, logdet) exactly as the PyTorch module.
    """
    n, c, hgt, wid = x.shape
    c1 = c // 2
    c2 = c - c1
    c_rrdb = ft.shape[1]
    p = hgt * wid
    p_tile = _pick_p_tile(p)
    n_tiles = p // p_tile

    # NCHW -> (N, C, H*W): channels on sublanes, spatial on lanes (pure reshape).
    x_flat = x.reshape(n, c, p)
    ft_flat = ft.reshape(n, c_rrdb, p)

    (w0, b0), *hidden_params, (w5, b5) = params
    hid = w0.shape[0]
    n_hidden = len(hidden_params)

    # Pack the 12 weight/bias tensors into 4 slabs -> fewer tiny DMAs.
    # Weight slabs are stored bf16 so the MXU sees bf16 operands directly.
    w0b = w0.astype(jnp.bfloat16)                                       # (H, c1+Crrdb)
    whb = jnp.stack([w for (w, _) in hidden_params], axis=0).astype(jnp.bfloat16)
    wob = jnp.concatenate([w5[0::2], w5[1::2]], axis=0).astype(jnp.bfloat16)  # (2*c2, H)
    b_pack = jnp.zeros((hid, 8), jnp.float32)
    b_pack = b_pack.at[:, 0].set(b0)
    for l, (_, bl) in enumerate(hidden_params):
        b_pack = b_pack.at[:, l + 1].set(bl)
    b_pack = b_pack.at[:c2, 5].set(b5[0::2])
    b_pack = b_pack.at[:c2, 6].set(b5[1::2])

    kernel = functools.partial(_affine_kernel, c1=c1, c2=c2,
                               n_hidden=n_hidden, reverse=reverse)

    z_flat, ld_part = pl.pallas_call(
        kernel,
        out_shape=(jax.ShapeDtypeStruct((n, c, p), jnp.float32),
                   jax.ShapeDtypeStruct((n, 1, p), jnp.float32)),
        grid=(n, n_tiles),
        in_specs=[
            pl.BlockSpec((1, c, p_tile), lambda i, j: (i, 0, j)),
            pl.BlockSpec((1, c_rrdb, p_tile), lambda i, j: (i, 0, j)),
            # Weight/bias slabs: constant block index -> DMA'd once, VMEM-resident.
            pl.BlockSpec((hid, c1 + c_rrdb), lambda i, j: (0, 0)),
            pl.BlockSpec((n_hidden, hid, hid), lambda i, j: (0, 0, 0)),
            pl.BlockSpec((2 * c2, hid), lambda i, j: (0, 0)),
            pl.BlockSpec((hid, 8), lambda i, j: (0, 0)),
        ],
        out_specs=(
            pl.BlockSpec((1, c, p_tile), lambda i, j: (i, 0, j)),
            pl.BlockSpec((1, 1, p_tile), lambda i, j: (i, 0, j)),  # per-tile partials
        ),
        compiler_params=pltpu.CompilerParams(
            # No cross-iteration state -> both axes parallel (v7x megacore can
            # shard samples and spatial tiles across its 2 TensorCores).
            dimension_semantics=("parallel", "parallel"),
            vmem_limit_bytes=32 * 1024 * 1024),
    )(x_flat, ft_flat, w0b, whb, wob, b_pack)

    z_out = z_flat.reshape(n, c, hgt, wid)                 # already NCHW order
    ld_contrib = jnp.sum(ld_part, axis=(1, 2))             # (N,)
    logdet_out = logdet - ld_contrib if reverse else logdet + ld_contrib
    return z_out, logdet_out


def _reference_forward(x, ft, logdet, params, reverse=False):
    """Pure-JAX f32 reference mirroring the PyTorch module."""
    c = x.shape[1]
    c1 = c // 2
    z1, z2 = x[:, :c1], x[:, c1:]
    h = jnp.concatenate([z1, ft], axis=1)
    for i, (w, b) in enumerate(params):
        h = jnp.einsum('oi,nihw->nohw', w, h) + b[None, :, None, None]
        if i < len(params) - 1:
            h = jnp.maximum(h, 0.0)
    shift = h[:, 0::2]
    scale = jax.nn.sigmoid(h[:, 1::2] + 2.0) + AFFINE_EPS
    if reverse:
        z2n = z2 / scale - shift
        ld = logdet - jnp.sum(jnp.log(scale), axis=(1, 2, 3))
    else:
        z2n = (z2 + shift) * scale
        ld = logdet + jnp.sum(jnp.log(scale), axis=(1, 2, 3))
    return jnp.concatenate([z1, z2n], axis=1), ld


if __name__ == "__main__":
    key = jax.random.PRNGKey(0)
    kx, kf, kp = jax.random.split(key, 3)

    N, C, H, W = 2, 4, 16, 16          # in_channels = 4
    x = jax.random.normal(kx, (N, C, H, W), jnp.float32)
    ft = jax.random.normal(kf, (N, IN_CHANNELS_RRDB, H, W), jnp.float32)
    logdet = jnp.zeros((N,), jnp.float32)

    params = init_faffine_params(kp, in_channels=C)

    out, ld = cond_affine_separated_and_cond_2dtoy(x, ft, logdet, params,
                                                   reverse=False)
    jax.block_until_ready((out, ld))
    assert out.shape == (N, C, H, W) and ld.shape == (N,)

    # Correctness vs. pure-JAX f32 reference (tolerance covers bf16 MXU dots).
    ref_out, ref_ld = _reference_forward(x, ft, logdet, params, reverse=False)
    assert jnp.allclose(out, ref_out, atol=5e-2, rtol=5e-2), \
        float(jnp.max(jnp.abs(out - ref_out)))
    assert jnp.allclose(ld, ref_ld, atol=1.0, rtol=2e-2), (ld, ref_ld)

    # Reverse pass: kernel-vs-kernel round trip should invert tightly
    # (scale/shift are recomputed identically from the untouched z1 half).
    x_rt, ld_rt = cond_affine_separated_and_cond_2dtoy(out, ft, ld, params,
                                                       reverse=True)
    jax.block_until_ready((x_rt, ld_rt))
    assert jnp.allclose(x_rt, x, atol=1e-4, rtol=1e-4), \
        float(jnp.max(jnp.abs(x_rt - x)))
    assert jnp.allclose(ld_rt, logdet, atol=1e-2), (ld_rt, logdet)

    print("KERNEL_OK")
</pallas_src>

<mosaic_0001>
module attributes {stable_mosaic.version = 11 : i64} {
  func.func @_affine_kernel(%arg0: i32, %arg1: i32, %arg2: memref<1x4x256xf32, #tpu.memory_space<vmem>>, %arg3: memref<1x2x256xf32, #tpu.memory_space<vmem>>, %arg4: memref<32x4xbf16, #tpu.memory_space<vmem>>, %arg5: memref<4x32x32xbf16, #tpu.memory_space<vmem>>, %arg6: memref<4x32xbf16, #tpu.memory_space<vmem>>, %arg7: memref<32x8xf32, #tpu.memory_space<vmem>>, %arg8: memref<1x4x256xf32, #tpu.memory_space<vmem>>, %arg9: memref<1x1x256xf32, #tpu.memory_space<vmem>>) attributes {dimension_semantics = [#tpu.dimension_semantics<parallel>, #tpu.dimension_semantics<parallel>], iteration_bounds = array<i64: 2, 1>, scalar_prefetch = 0 : i64, scratch_operands = 0 : i64, tpu.core_type = #tpu.core_type<tc>, window_params = [{transform_indices = @transform_0, window_bounds = array<i64: 1, 4, 256>}, {transform_indices = @transform_1, window_bounds = array<i64: 1, 2, 256>}, {pipeline_mode = #tpu.pipeline_mode<synchronous>, transform_indices = @transform_2, window_bounds = array<i64: 32, 4>}, {pipeline_mode = #tpu.pipeline_mode<synchronous>, transform_indices = @transform_3, window_bounds = array<i64: 4, 32, 32>}, {pipeline_mode = #tpu.pipeline_mode<synchronous>, transform_indices = @transform_4, window_bounds = array<i64: 4, 32>}, {pipeline_mode = #tpu.pipeline_mode<synchronous>, transform_indices = @transform_5, window_bounds = array<i64: 32, 8>}, {transform_indices = @transform_6, window_bounds = array<i64: 1, 4, 256>}, {transform_indices = @transform_7, window_bounds = array<i64: 1, 1, 256>}]} {
    %c0 = arith.constant 0 : index
    %c0_0 = arith.constant 0 : index
    %c0_1 = arith.constant 0 : index
    %0 = vector.load %arg2[%c0, %c0_0, %c0_1] : memref<1x4x256xf32, #tpu.memory_space<vmem>>, vector<1x4x256xf32>
    %1 = vector.shape_cast %0 : vector<1x4x256xf32> to vector<4x256xf32>
    %2 = vector.extract_strided_slice %1 {offsets = [0, 0], sizes = [2, 256], strides = [1, 1]} : vector<4x256xf32> to vector<2x256xf32>
    %3 = vector.extract_strided_slice %1 {offsets = [2, 0], sizes = [2, 256], strides = [1, 1]} : vector<4x256xf32> to vector<2x256xf32>
    %c0_2 = arith.constant 0 : index
    %c0_3 = arith.constant 0 : index
    %c0_4 = arith.constant 0 : index
    %4 = vector.load %arg3[%c0_2, %c0_3, %c0_4] : memref<1x2x256xf32, #tpu.memory_space<vmem>>, vector<1x2x256xf32>
    %5 = vector.shape_cast %4 : vector<1x2x256xf32> to vector<2x256xf32>
    %c0_5 = arith.constant 0 : index
    %c0_6 = arith.constant 0 : index
    %6 = vector.load %arg7[%c0_5, %c0_6] : memref<32x8xf32, #tpu.memory_space<vmem>>, vector<32x8xf32>
    %c0_7 = arith.constant 0 : index
    %c0_8 = arith.constant 0 : index
    %7 = vector.load %arg4[%c0_7, %c0_8] : memref<32x4xbf16, #tpu.memory_space<vmem>>, vector<32x4xbf16>
    %8 = arith.truncf %2 : vector<2x256xf32> to vector<2x256xbf16>
    %9 = arith.truncf %5 : vector<2x256xf32> to vector<2x256xbf16>
    %10 = vector.extract_strided_slice %7 {offsets = [0, 0], sizes = [32, 2], strides = [1, 1]} : vector<32x4xbf16> to vector<32x2xbf16>
    %cst = arith.constant dense<0.000000e+00> : vector<32x256xf32>
    %11 = tpu.matmul %10, %8, %cst {dimension_numbers = #tpu.dot_dimension_numbers<[1], [0], [0], [1], [0, 0, 1, 1], [], []>} : vector<32x2xbf16>, vector<2x256xbf16>, vector<32x256xf32> -> vector<32x256xf32>
    %12 = vector.extract_strided_slice %7 {offsets = [0, 2], sizes = [32, 2], strides = [1, 1]} : vector<32x4xbf16> to vector<32x2xbf16>
    %cst_9 = arith.constant dense<0.000000e+00> : vector<32x256xf32>
    %13 = tpu.matmul %12, %9, %cst_9 {dimension_numbers = #tpu.dot_dimension_numbers<[1], [0], [0], [1], [0, 0, 1, 1], [], []>} : vector<32x2xbf16>, vector<2x256xbf16>, vector<32x256xf32> -> vector<32x256xf32>
    %14 = arith.addf %11, %13 : vector<32x256xf32>
    %15 = vector.extract_strided_slice %6 {offsets = [0, 0], sizes = [32, 1], strides = [1, 1]} : vector<32x8xf32> to vector<32x1xf32>
    %16 = vector.broadcast %15 : vector<32x1xf32> to vector<32x256xf32>
    %17 = arith.addf %14, %16 : vector<32x256xf32>
    %cst_10 = arith.constant 0.000000e+00 : f32
    %18 = vector.broadcast %cst_10 : f32 to vector<32x256xf32>
    %19 = arith.maximumf %17, %18 : vector<32x256xf32>
    %20 = arith.truncf %19 : vector<32x256xf32> to vector<32x256xbf16>
    %c0_11 = arith.constant 0 : index
    %c0_12 = arith.constant 0 : index
    %c0_13 = arith.constant 0 : index
    %21 = vector.load %arg5[%c0_11, %c0_12, %c0_13] : memref<4x32x32xbf16, #tpu.memory_space<vmem>>, vector<1x32x32xbf16>
    %22 = vector.shape_cast %21 : vector<1x32x32xbf16> to vector<32x32xbf16>
    %cst_14 = arith.constant dense<0.000000e+00> : vector<32x256xf32>
    %23 = tpu.matmul %22, %20, %cst_14 {dimension_numbers = #tpu.dot_dimension_numbers<[1], [0], [0], [1], [0, 0, 1, 1], [], []>} : vector<32x32xbf16>, vector<32x256xbf16>, vector<32x256xf32> -> vector<32x256xf32>
    %24 = vector.extract_strided_slice %6 {offsets = [0, 1], sizes = [32, 1], strides = [1, 1]} : vector<32x8xf32> to vector<32x1xf32>
    %25 = vector.broadcast %24 : vector<32x1xf32> to vector<32x256xf32>
    %26 = arith.addf %23, %25 : vector<32x256xf32>
    %cst_15 = arith.constant 0.000000e+00 : f32
    %27 = vector.broadcast %cst_15 : f32 to vector<32x256xf32>
    %28 = arith.maximumf %26, %27 : vector<32x256xf32>
    %29 = arith.truncf %28 : vector<32x256xf32> to vector<32x256xbf16>
    %c1 = arith.constant 1 : index
    %c0_16 = arith.constant 0 : index
    %c0_17 = arith.constant 0 : index
    %30 = vector.load %arg5[%c1, %c0_16, %c0_17] : memref<4x32x32xbf16, #tpu.memory_space<vmem>>, vector<1x32x32xbf16>
    %31 = vector.shape_cast %30 : vector<1x32x32xbf16> to vector<32x32xbf16>
    %cst_18 = arith.constant dense<0.000000e+00> : vector<32x256xf32>
    %32 = tpu.matmul %31, %29, %cst_18 {dimension_numbers = #tpu.dot_dimension_numbers<[1], [0], [0], [1], [0, 0, 1, 1], [], []>} : vector<32x32xbf16>, vector<32x256xbf16>, vector<32x256xf32> -> vector<32x256xf32>
    %33 = vector.extract_strided_slice %6 {offsets = [0, 2], sizes = [32, 1], strides = [1, 1]} : vector<32x8xf32> to vector<32x1xf32>
    %34 = vector.broadcast %33 : vector<32x1xf32> to vector<32x256xf32>
    %35 = arith.addf %32, %34 : vector<32x256xf32>
    %cst_19 = arith.constant 0.000000e+00 : f32
    %36 = vector.broadcast %cst_19 : f32 to vector<32x256xf32>
    %37 = arith.maximumf %35, %36 : vector<32x256xf32>
    %38 = arith.truncf %37 : vector<32x256xf32> to vector<32x256xbf16>
    %c2 = arith.constant 2 : index
    %c0_20 = arith.constant 0 : index
    %c0_21 = arith.constant 0 : index
    %39 = vector.load %arg5[%c2, %c0_20, %c0_21] : memref<4x32x32xbf16, #tpu.memory_space<vmem>>, vector<1x32x32xbf16>
    %40 = vector.shape_cast %39 : vector<1x32x32xbf16> to vector<32x32xbf16>
    %cst_22 = arith.constant dense<0.000000e+00> : vector<32x256xf32>
    %41 = tpu.matmul %40, %38, %cst_22 {dimension_numbers = #tpu.dot_dimension_numbers<[1], [0], [0], [1], [0, 0, 1, 1], [], []>} : vector<32x32xbf16>, vector<32x256xbf16>, vector<32x256xf32> -> vector<32x256xf32>
    %42 = vector.extract_strided_slice %6 {offsets = [0, 3], sizes = [32, 1], strides = [1, 1]} : vector<32x8xf32> to vector<32x1xf32>
    %43 = vector.broadcast %42 : vector<32x1xf32> to vector<32x256xf32>
    %44 = arith.addf %41, %43 : vector<32x256xf32>
    %cst_23 = arith.constant 0.000000e+00 : f32
    %45 = vector.broadcast %cst_23 : f32 to vector<32x256xf32>
    %46 = arith.maximumf %44, %45 : vector<32x256xf32>
    %47 = arith.truncf %46 : vector<32x256xf32> to vector<32x256xbf16>
    %c3 = arith.constant 3 : index
    %c0_24 = arith.constant 0 : index
    %c0_25 = arith.constant 0 : index
    %48 = vector.load %arg5[%c3, %c0_24, %c0_25] : memref<4x32x32xbf16, #tpu.memory_space<vmem>>, vector<1x32x32xbf16>
    %49 = vector.shape_cast %48 : vector<1x32x32xbf16> to vector<32x32xbf16>
    %cst_26 = arith.constant dense<0.000000e+00> : vector<32x256xf32>
    %50 = tpu.matmul %49, %47, %cst_26 {dimension_numbers = #tpu.dot_dimension_numbers<[1], [0], [0], [1], [0, 0, 1, 1], [], []>} : vector<32x32xbf16>, vector<32x256xbf16>, vector<32x256xf32> -> vector<32x256xf32>
    %51 = vector.extract_strided_slice %6 {offsets = [0, 4], sizes = [32, 1], strides = [1, 1]} : vector<32x8xf32> to vector<32x1xf32>
    %52 = vector.broadcast %51 : vector<32x1xf32> to vector<32x256xf32>
    %53 = arith.addf %50, %52 : vector<32x256xf32>
    %cst_27 = arith.constant 0.000000e+00 : f32
    %54 = vector.broadcast %cst_27 : f32 to vector<32x256xf32>
    %55 = arith.maximumf %53, %54 : vector<32x256xf32>
    %56 = arith.truncf %55 : vector<32x256xf32> to vector<32x256xbf16>
    %c0_28 = arith.constant 0 : index
    %c0_29 = arith.constant 0 : index
    %57 = vector.load %arg6[%c0_28, %c0_29] : memref<4x32xbf16, #tpu.memory_space<vmem>>, vector<4x32xbf16>
    %cst_30 = arith.constant dense<0.000000e+00> : vector<4x256xf32>
    %58 = tpu.matmul %57, %56, %cst_30 {dimension_numbers = #tpu.dot_dimension_numbers<[1], [0], [0], [1], [0, 0, 1, 1], [], []>} : vector<4x32xbf16>, vector<32x256xbf16>, vector<4x256xf32> -> vector<4x256xf32>
    %59 = vector.extract_strided_slice %58 {offsets = [0, 0], sizes = [2, 256], strides = [1, 1]} : vector<4x256xf32> to vector<2x256xf32>
    %60 = vector.extract_strided_slice %6 {offsets = [0, 5], sizes = [2, 1], strides = [1, 1]} : vector<32x8xf32> to vector<2x1xf32>
    %61 = vector.broadcast %60 : vector<2x1xf32> to vector<2x256xf32>
    %62 = arith.addf %59, %61 : vector<2x256xf32>
    %63 = vector.extract_strided_slice %58 {offsets = [2, 0], sizes = [2, 256], strides = [1, 1]} : vector<4x256xf32> to vector<2x256xf32>
    %64 = vector.extract_strided_slice %6 {offsets = [0, 6], sizes = [2, 1], strides = [1, 1]} : vector<32x8xf32> to vector<2x1xf32>
    %65 = vector.broadcast %64 : vector<2x1xf32> to vector<2x256xf32>
    %66 = arith.addf %63, %65 : vector<2x256xf32>
    %cst_31 = arith.constant 2.000000e+00 : f32
    %67 = vector.broadcast %cst_31 : f32 to vector<2x256xf32>
    %68 = arith.addf %66, %67 : vector<2x256xf32>
    %69 = arith.negf %68 : vector<2x256xf32>
    %70 = math.exp %69 : vector<2x256xf32>
    %cst_32 = arith.constant 1.000000e+00 : f32
    %71 = vector.broadcast %cst_32 : f32 to vector<2x256xf32>
    %72 = arith.addf %71, %70 : vector<2x256xf32>
    %73 = arith.divf %71, %72 : vector<2x256xf32>
    %cst_33 = arith.constant 9.99999974E-5 : f32
    %74 = vector.broadcast %cst_33 : f32 to vector<2x256xf32>
    %75 = arith.addf %73, %74 : vector<2x256xf32>
    %76 = arith.addf %3, %62 : vector<2x256xf32>
    %77 = arith.mulf %76, %75 : vector<2x256xf32>
    %c0_34 = arith.constant 0 : index
    %c0_35 = arith.constant 0 : index
    %c0_36 = arith.constant 0 : index
    %78 = vector.load %arg8[%c0_34, %c0_35, %c0_36] : memref<1x4x256xf32, #tpu.memory_space<vmem>>, vector<1x2x256xf32>
    %79 = vector.shape_cast %78 : vector<1x2x256xf32> to vector<2x256xf32>
    %80 = vector.shape_cast %2 : vector<2x256xf32> to vector<1x2x256xf32>
    tpu.vector_store %arg8[%c0_34, %c0_35, %c0_36], %80 {strides = array<i32>} : memref<1x4x256xf32, #tpu.memory_space<vmem>>, vector<1x2x256xf32>,
    %c0_37 = arith.constant 0 : index
    %c2_38 = arith.constant 2 : index
    %c0_39 = arith.constant 0 : index
    %81 = vector.load %arg8[%c0_37, %c2_38, %c0_39] : memref<1x4x256xf32, #tpu.memory_space<vmem>>, vector<1x2x256xf32>
    %82 = vector.shape_cast %81 : vector<1x2x256xf32> to vector<2x256xf32>
    %83 = vector.shape_cast %77 : vector<2x256xf32> to vector<1x2x256xf32>
    tpu.vector_store %arg8[%c0_37, %c2_38, %c0_39], %83 {strides = array<i32>} : memref<1x4x256xf32, #tpu.memory_space<vmem>>, vector<1x2x256xf32>,
    %84 = math.log %75 : vector<2x256xf32>
    %cst_40 = arith.constant dense<0.000000e+00> : vector<256xf32>
    %85 = vector.multi_reduction <add>, %84, %cst_40 [0] : vector<2x256xf32> to vector<256xf32>
    %86 = vector.shape_cast %85 : vector<256xf32> to vector<1x256xf32>
    %c0_41 = arith.constant 0 : index
    %c0_42 = arith.constant 0 : index
    %c0_43 = arith.constant 0 : index
    %87 = vector.load %arg9[%c0_41, %c0_42, %c0_43] : memref<1x1x256xf32, #tpu.memory_space<vmem>>, vector<1x1x256xf32>
    %88 = vector.shape_cast %87 : vector<1x1x256xf32> to vector<1x256xf32>
    %89 = vector.shape_cast %86 : vector<1x256xf32> to vector<1x1x256xf32>
    tpu.vector_store %arg9[%c0_41, %c0_42, %c0_43], %89 {strides = array<i32>} : memref<1x1x256xf32, #tpu.memory_space<vmem>>, vector<1x1x256xf32>,
    return
  }
  func.func @transform_0(%arg0: i32, %arg1: i32) -> (i32, i32, i32) {
    %c0_i32 = arith.constant 0 : i32
    %c0_i32_0 = arith.constant 0 : i32
    return %arg0, %c0_i32, %arg1 : i32, i32, i32
  }
  func.func @transform_1(%arg0: i32, %arg1: i32) -> (i32, i32, i32) {
    %c0_i32 = arith.constant 0 : i32
    %c0_i32_0 = arith.constant 0 : i32
    return %arg0, %c0_i32, %arg1 : i32, i32, i32
  }
  func.func @transform_2(%arg0: i32, %arg1: i32) -> (i32, i32) {
    %c0_i32 = arith.constant 0 : i32
    %c0_i32_0 = arith.constant 0 : i32
    %c0_i32_1 = arith.constant 0 : i32
    return %c0_i32, %c0_i32_0 : i32, i32
  }
  func.func @transform_3(%arg0: i32, %arg1: i32) -> (i32, i32, i32) {
    %c0_i32 = arith.constant 0 : i32
    %c0_i32_0 = arith.constant 0 : i32
    %c0_i32_1 = arith.constant 0 : i32
    %c0_i32_2 = arith.constant 0 : i32
    return %c0_i32, %c0_i32_0, %c0_i32_1 : i32, i32, i32
  }
  func.func @transform_4(%arg0: i32, %arg1: i32) -> (i32, i32) {
    %c0_i32 = arith.constant 0 : i32
    %c0_i32_0 = arith.constant 0 : i32
    %c0_i32_1 = arith.constant 0 : i32
    return %c0_i32, %c0_i32_0 : i32, i32
  }
  func.func @transform_5(%arg0: i32, %arg1: i32) -> (i32, i32) {
    %c0_i32 = arith.constant 0 : i32
    %c0_i32_0 = arith.constant 0 : i32
    %c0_i32_1 = arith.constant 0 : i32
    return %c0_i32, %c0_i32_0 : i32, i32
  }
  func.func @transform_6(%arg0: i32, %arg1: i32) -> (i32, i32, i32) {
    %c0_i32 = arith.constant 0 : i32
    %c0_i32_0 = arith.constant 0 : i32
    return %arg0, %c0_i32, %arg1 : i32, i32, i32
  }
  func.func @transform_7(%arg0: i32, %arg1: i32) -> (i32, i32, i32) {
    %c0_i32 = arith.constant 0 : i32
    %c0_i32_0 = arith.constant 0 : i32
    return %arg0, %c0_i32, %arg1 : i32, i32, i32
  }
}

</mosaic_0001>

<bundles_post_ra>
// kernel: cond_affine_separated_and_cond_2dtoy.1
= control target key start
LH: loop header
LB: loop body
LE: loop exit
PB: predicated region body
PF: predicated region fallthrough
CT: control target
= control target key end

     0   :  { %s1490_s24 = smov 0   ;;  %s1492_s25 = smov 0   ;;  %s1653_s0 = inlined_call_operand.vmem [shape: f32[2,4,256], index: 0, kind: input, shape index: {}]   ;;  %s1654_s1 = inlined_call_operand.vmem [shape: f32[2,2,256], index: 1, kind: input, shape index: {}]   ;;  %s1655_s2 = inlined_call_operand.vmem [shape: bf16[32,4], index: 2, kind: input, shape index: {}]   ;;  %s1656_s3 = inlined_call_operand.vmem [shape: bf16[4,32,32], index: 3, kind: input, shape index: {}]   ;;  %s1657_s4 = inlined_call_operand.vmem [shape: bf16[4,32], index: 4, kind: input, shape index: {}]   ;;  %s1658_s5 = inlined_call_operand.vmem [shape: f32[32,8], index: 5, kind: input, shape index: {}]   ;;  %s1659_s6 = inlined_call_operand.vmem [shape: f32[2,4,256], index: 6, kind: output, shape index: {0}]   ;;  %s1660_s7 = inlined_call_operand.vmem [shape: f32[2,1,256], index: 7, kind: output, shape index: {1}]  }
   0x1   :  { %s1494_s26 = smov 0  }
   0x2 LB: > { %s30_s27 = sadd.s32 1, %s1435_s25  ;;  %p1287_p0 = scmp.ge.s32.totalorder %s1439_s26, 1  ;;  %s1439_s26 = sphi %s1494_s26, %s18_s26   ;;  %s1435_s25 = sphi %s1492_s25, %s1662_s25   ;;  %s1431_s24 = sphi %s1490_s24, %s1661_s24  }
   0x3   : > { %p32_p1 = scmp.ge.s32.totalorder %s30_s27, 2  ;;  %p280_p2 = scmp.lt.s32.totalorder %s1439_s26, 3 }
   0x5   : > { %s1664_s27 = smov (%p32_p1, %s30_s27), 0  ;;  %p281_p3 = pnand %p1287_p0, %p280_p2 }
   0x6   : > { %v1394_v0 = vld [vmem:[%s1655_s2] sm:$0xff] (!%p281_p3)   ;;  %p338_p4 = scmp.lt.s32.totalorder (!%p281_p3), %s1431_s24, 1  ;;  %s1441_s30 = smov (!%p281_p3), 126   ;;  %v1395_v1 = vld [vmem:[%s1655_s2 + $0x8] sm:$0xff] (!%p281_p3)   ;;  %v1442_v2 = vmov (!%p281_p3), 0   ;;  %vm426_vm0 = vcmask (!%p281_p3), 1040384  }
   0x7   : > { %284 = sbr.rel (%p281_p3) target bundleno = 1583 (0x62f), region = 44  ;;  %415 = vrot.lane.b32.xlu0 (!%p281_p3), %v1394_v0, %s1441_s30  ;;  %465 = vmatprep.mubr.bf16.mxu0 (!%p281_p3), %v1442_v2  ;;  %v1539_v11 = vld [vmem:[%s1658_s5] sm:$0xff] (!%p281_p3)  ;;  %v1546_v12 = vld [vmem:[%s1658_s5 + $0x10] sm:$0xff] (!%p281_p3)  ;;  %v1551_v13 = vld [vmem:[%s1658_s5 + $0x8] sm:$0xff] (!%p281_p3)  ;;  %vm419_vm1 = vcmask (!%p281_p3), 15360   ;;  %v1443_v19 = vmov (!%p281_p3), 1  }
   0x8   : > { %1381 = vset.pattern.permute.xlu1 (!%p281_p3), %v1442_v2  ;;  %1382 = vset.pattern.permute.xlu0 (!%p281_p3), %v1442_v2  ;;  %v1558_v14 = vld [vmem:[%s1658_s5 + $0x18] sm:$0xff] (!%p281_p3)  ;;  %v1397_v52 = vld [vmem:[%s1656_s3] sm:$0xff] (!%p281_p3)   ;;  %vm621_vm2 = vcmask (!%p281_p3), 261120   ;;  %v1398_v53 = vld [vmem:[%s1656_s3 + $0x8] sm:$0xff] (!%p281_p3)   ;;  %v1444_v54 = vmov (!%p281_p3), 2   ;;  %vm1096_vm3 = vcmask (!%p281_p3), 1041408  }
   0x9   : > { %660 = vmatprep.mubr.bf16.mxu1 (!%p281_p3), %v1442_v2  ;;  %553 = vperm.xlu1 (!%p281_p3), %1381, %v1539_v11  }
   0xb   : > { %417 = vrot.lane.b32.xlu0 (!%p281_p3), %v1395_v1, %s1441_s30 }
   0xd   : > { %558 = vperm.xlu1 (!%p281_p3), %1381, %v1551_v13  }
   0xe   : > { %s1666_s24 = smov (!%p338_p4, %s1431_s24), 1 }
   0xf   : > { %s1337_s10 = sshll.u32 %s1666_s24, 3  ;;  %s1338_s11 = sshll.u32 %s1666_s24, 2  ;;  %563 = vperm.xlu0 %1382, %v1546_v12  }
  0x10   : > { %s355_s14 = scalar_lea.vmem %s1654_s1, %s1338_s11  ;;  %s345_s17 = scalar_lea.vmem %s1653_s0, %s1337_s10 }
  0x11   : > { %v1295_v3 = vld.sshfl [vmem:[%s355_s14] sm:$0x33 pattern:$0x76325410]  ;;  %568 = vperm.xlu1 %1381, %v1558_v14   ;;  %s1634_s9 = scalar_lea.vmem %s1659_s6, %s1337_s10  ;;  %s1294_s10 = sshll.u32 %s1666_s24, 1 }
  0x12   : > { %v400_v4 = vcombine.high %v1295_v3, %v1295_v3  ;;  %v403_v5 = vpack.c.bf16 %v1295_v3, %v1295_v3  ;;  %v1530_v6 = vld [vmem:[%s345_s17] sm:$0xff]  ;;  %s374_s13 = scalar_lea.vmem %s1660_s7, %s1294_s10 }
  0x13   : > { %v388_v7 = vcombine.high %v1530_v6, %v1530_v6  ;;  %v390_v15 = vpack.c.bf16 %v1530_v6, %v1530_v6  ;;  %1384 = vset.pattern.permute.xlu0 %v1443_v19  ;;  %1084 = vst [vmem:[%s1634_s9] sm:$0x33] %v1530_v6 }
  0x14   : > { %v404_v8 = vpack.c.bf16 %v400_v4, %v400_v4  ;;  %v428_v9 = vsel %vm426_vm0, %v403_v5, 0  ;;  %600 = vperm.xlu0 %1384, %v1551_v13  }
  0x15   : > { %v391_v10 = vpack.c.bf16 %v388_v7, %v388_v7  ;;  %v493_v16 = vsel %vm426_vm0, %v390_v15, 0  ;;  %1383 = vset.pattern.permute.xlu1 %v1443_v19 }
  0x16   : > { %1298 = vmatprep.subr.msk.bf16.mxu0 %vm426_vm0, %v404_v8  ;;  %596 = vperm.xlu1 %1383, %v1539_v11  }
  0x17   : > { %434 = vmatpush1.bf16.msra.mxu0 %v428_v9 }
  0x18   : > { %1301 = vmatprep.subr.msk.bf16.mxu0 %vm426_vm0, %v391_v10  ;;  %1385 = vset.pattern.permute.xlu0 %v1444_v54 }
  0x19   : > { %699 = vperm.xlu0 %1385, %v1539_v11  }
  0x1a   : > { %604 = vperm.xlu1 %1383, %v1546_v12  }
  0x1d   : > { %711 = vperm.xlu0 %1385, %v1558_v14  }
  0x1e   : > { %608 = vperm.xlu1 %1383, %v1558_v14  }
  0x22   : > { %1386 = vset.pattern.permute.xlu1 %v1444_v54 }
  0x23   : > { %703 = vperm.xlu1 %1386, %v1551_v13  }
  0x27   : > { %707 = vperm.xlu1 %1386, %v1546_v12  }
  0x79   : > { %v416_v17 = vpop.permute.xlu0 %415 }
  0x7a   : > { %1299 = vmatmul.mubr.msk.bf16.vlgmr.msra.gmra.mrb[0].mxu0 %vm419_vm1, %v416_v17 }
  0x7b   : > { %499 = vmatpush1.bf16.msra.mxu0 %v493_v16  ;;  %475 = vmatprep.mubr.bf16.mxu0 %v1442_v2 }
  0x7d   : > { %v418_v18 = vpop.permute.xlu0 %417 }
  0x82   : > { %1300 = vmatmul.mubr.msk.bf16.gmra.mrb[4].mxu0 %vm419_vm1, %v418_v18 }
  0x83   : > { %530 = vmatprep.mubr.bf16.mxu0 %v1442_v2 }
  0x88   : > { %v554_v20 = vpop.permute.xlu1 %553 }
  0x8a   : > { %1302 = vmatmul.mubr.msk.bf16.vlgmr.msra.gmra.mrb[0].mxu0 %vm419_vm1, %v1394_v0 }
  0x8b   : > { %540 = vmatprep.mubr.bf16.mxu0 %v1442_v2 }
  0x8c   : > { %v559_v24 = vpop.permute.xlu1 %558 }
  0x8e   : > { %v564_v34 = vpop.permute.xlu0 %563 }
  0x90   : > { %v569_v40 = vpop.permute.xlu1 %568 }
  0x92   : > { %1303 = vmatmul.mubr.msk.bf16.gmra.mrb[4].mxu0 %vm419_vm1, %v1395_v1 }
  0x93   : > { %864 = vmatprep.mubr.bf16.mxu0 %v1442_v2  ;;  %v601_v57 = vpop.permute.xlu0 %600 }
  0x95   : > { %v597_v55 = vpop.permute.xlu1 %596 }
  0x99   : > { %v605_v0 = vpop.permute.xlu1 %604 }
  0x9d   : > { %v609_v17 = vpop.permute.xlu1 %608 }
 0x15d   : > { %v532_v21 = vpop.f32.mrb[0].mxu0 }
 0x15e   : > { %v571_v22 = vadd.f32 %v554_v20, %v532_v21  ;;  %v534_v23 = vpop.f32.mrb[1].mxu0 }
 0x15f   : > { %v572_v25 = vadd.f32 %v554_v20, %v534_v23  ;;  %v536_v26 = vpop.f32.mrb[2].mxu0 }
 0x160   : > { %v573_v27 = vadd.f32 %v559_v24, %v536_v26  ;;  %v538_v28 = vpop.f32.mrb[3].mxu0  ;;  %v579_v30 = vmax.f32 %v571_v22, 0.0 }
 0x161   : > { %v574_v29 = vadd.f32 %v559_v24, %v538_v28  ;;  %v580_v32 = vmax.f32 %v572_v25, 0.0 }
 0x162   : > { %v581_v31 = vmax.f32 %v573_v27, 0.0 }
 0x163   : > { %v582_v33 = vmax.f32 %v574_v29, 0.0  ;;  %v1399_v29 = vld [vmem:[%s1656_s3 + $0x10] sm:$0xff]  }
 0x164   : > { %v587_v35 = vpack.c.bf16 %v581_v31, %v579_v30  ;;  %v1400_v30 = vld [vmem:[%s1656_s3 + $0x18] sm:$0xff]   ;;  %v1445_v31 = vmov 3  }
 0x165   : > { %v542_v36 = vpop.f32.mrb[4].mxu0  ;;  %v588_v37 = vpack.c.bf16 %v582_v33, %v580_v32  ;;  %1387 = vset.pattern.permute.xlu1 %v1445_v31  ;;  %1388 = vset.pattern.permute.xlu0 %v1445_v31  ;;  %v700_v32 = vpop.permute.xlu0 %699 }
 0x166   : > { %v575_v38 = vadd.f32 %v564_v34, %v542_v36  ;;  %v544_v39 = vpop.f32.mrb[5].mxu0  ;;  %801 = vperm.xlu1 %1387, %v1539_v11   ;;  %805 = vperm.xlu0 %1388, %v1551_v13   ;;  %v704_v33 = vpop.permute.xlu1 %703 }
 0x167   : > { %v576_v41 = vadd.f32 %v564_v34, %v544_v39  ;;  %v546_v42 = vpop.f32.mrb[6].mxu0  ;;  %628 = vmatprep.subr.bf16.mxu1 %v588_v37 }
 0x168   : > { %v577_v43 = vadd.f32 %v569_v40, %v546_v42  ;;  %v548_v44 = vpop.f32.mrb[7].mxu0  ;;  %629 = vmatpush1.bf16.msra.mxu1 %v587_v35  ;;  %v583_v46 = vmax.f32 %v575_v38, 0.0 }
 0x169   : > { %v578_v45 = vadd.f32 %v569_v40, %v548_v44  ;;  %v584_v48 = vmax.f32 %v576_v41, 0.0 }
 0x16a   : > { %v585_v47 = vmax.f32 %v577_v43, 0.0  ;;  %809 = vperm.xlu1 %1387, %v1546_v12  }
 0x16b   : > { %v586_v49 = vmax.f32 %v578_v45, 0.0  ;;  %v708_v45 = vpop.permute.xlu1 %707 }
 0x16c   : > { %v589_v50 = vpack.c.bf16 %v585_v47, %v583_v46 }
 0x16d   : > { %v590_v51 = vpack.c.bf16 %v586_v49, %v584_v48 }
 0x16e   : > { %813 = vperm.xlu1 %1387, %v1558_v14  }
 0x16f   : > { %630 = vmatprep.subr.bf16.mxu1 %v590_v51 }
 0x170   : > { %631 = vmatpush1.bf16.msra.mxu1 %v589_v50 }
 0x173   : > { %1306 = vmatmul.mubr.msk.bf16.vlgmr.msra.gmra.mrb[0].mxu1 %vm621_vm2, %v1397_v52  ;;  %v712_v52 = vpop.permute.xlu0 %711 }
 0x174   : > { %670 = vmatprep.mubr.bf16.mxu1 %v1442_v2 }
 0x17b   : > { %1307 = vmatmul.mubr.msk.bf16.gmra.mrb[4].mxu1 %vm621_vm2, %v1398_v53 }
 0x17c   : > { %762 = vmatprep.mubr.bf16.mxu1 %v1442_v2 }
 0x246   : > { %v662_v56 = vpop.f32.mrb[0].mxu1 }
 0x247   : > { %v663_v58 = vadd.f32 %v662_v56, %v597_v55  ;;  %v664_v59 = vpop.f32.mrb[1].mxu1 }
 0x248   : > { %v665_v60 = vadd.f32 %v664_v59, %v597_v55  ;;  %v666_v61 = vpop.f32.mrb[2].mxu1 }
 0x249   : > { %v667_v62 = vadd.f32 %v666_v61, %v601_v57  ;;  %v668_v63 = vpop.f32.mrb[3].mxu1  ;;  %v681_v3 = vmax.f32 %v663_v58, 0.0 }
 0x24a   : > { %v669_v1 = vadd.f32 %v668_v63, %v601_v57  ;;  %v682_v5 = vmax.f32 %v665_v60, 0.0 }
 0x24b   : > { %v683_v4 = vmax.f32 %v667_v62, 0.0 }
 0x24c   : > { %v684_v7 = vmax.f32 %v669_v1, 0.0  ;;  %v1402_v1 = vld [vmem:[%s1656_s3 + $0x28] sm:$0xff]  }
 0x24d   : > { %v689_v8 = vpack.c.bf16 %v683_v4, %v681_v3  ;;  %v1446_v3 = vmov 4   ;;  %v802_v4 = vpop.permute.xlu1 %801 }
 0x24e   : > { %v690_v9 = vpack.c.bf16 %v684_v7, %v682_v5  ;;  %v672_v10 = vpop.f32.mrb[4].mxu1  ;;  %1389 = vset.pattern.permute.xlu0 %v1446_v3  ;;  %1390 = vset.pattern.permute.xlu1 %v1446_v3  ;;  %v806_v7 = vpop.permute.xlu0 %805 }
 0x24f   : > { %v673_v15 = vadd.f32 %v672_v10, %v605_v0  ;;  %v674_v16 = vpop.f32.mrb[5].mxu1  ;;  %903 = vperm.xlu0 %1389, %v1539_v11   ;;  %907 = vperm.xlu1 %1390, %v1551_v13  }
 0x250   : > { %v675_v18 = vadd.f32 %v674_v16, %v605_v0  ;;  %v676_v19 = vpop.f32.mrb[6].mxu1  ;;  %730 = vmatprep.subr.bf16.mxu1 %v690_v9  ;;  %v1401_v0 = vld [vmem:[%s1656_s3 + $0x20] sm:$0xff]  }
 0x251   : > { %v677_v20 = vadd.f32 %v676_v19, %v609_v17  ;;  %v678_v21 = vpop.f32.mrb[7].mxu1  ;;  %731 = vmatpush1.bf16.msra.mxu1 %v689_v8  ;;  %v685_v23 = vmax.f32 %v673_v15, 0.0 }
 0x252   : > { %v679_v22 = vadd.f32 %v678_v21, %v609_v17  ;;  %v686_v25 = vmax.f32 %v675_v18, 0.0  ;;  %v810_v18 = vpop.permute.xlu1 %809 }
 0x253   : > { %v687_v24 = vmax.f32 %v677_v20, 0.0  ;;  %915 = vperm.xlu0 %1389, %v1558_v14   ;;  %911 = vperm.xlu1 %1390, %v1546_v12  }
 0x254   : > { %v688_v26 = vmax.f32 %v679_v22, 0.0 }
 0x255   : > { %v691_v27 = vpack.c.bf16 %v687_v24, %v685_v23 }
 0x256   : > { %v692_v28 = vpack.c.bf16 %v688_v26, %v686_v25  ;;  %v814_v26 = vpop.permute.xlu1 %813 }
 0x258   : > { %732 = vmatprep.subr.bf16.mxu1 %v692_v28 }
 0x259   : > { %733 = vmatpush1.bf16.msra.mxu1 %v691_v27 }
 0x25c   : > { %1314 = vmatmul.mubr.msk.bf16.vlgmr.msra.gmra.mrb[8].mxu1 %vm621_vm2, %v1399_v29 }
 0x25d   : > { %772 = vmatprep.mubr.bf16.mxu1 %v1442_v2 }
 0x264   : > { %1315 = vmatmul.mubr.msk.bf16.gmra.mrb[12].mxu1 %vm621_vm2, %v1400_v30 }
 0x265   : > { %966 = vmatprep.mubr.bf16.mxu1 %v1442_v2 }
 0x32f   : > { %v764_v34 = vpop.f32.mrb[8].mxu1 }
 0x330   : > { %v765_v35 = vadd.f32 %v764_v34, %v700_v32  ;;  %v766_v36 = vpop.f32.mrb[9].mxu1 }
 0x331   : > { %v767_v37 = vadd.f32 %v766_v36, %v700_v32  ;;  %v768_v38 = vpop.f32.mrb[10].mxu1 }
 0x332   : > { %v769_v39 = vadd.f32 %v768_v38, %v704_v33  ;;  %v770_v40 = vpop.f32.mrb[11].mxu1  ;;  %v783_v42 = vmax.f32 %v765_v35, 0.0  ;;  %v1403_v38 = vld [vmem:[%s1656_s3 + $0x30] sm:$0xff]  }
 0x333   : > { %v771_v41 = vadd.f32 %v770_v40, %v704_v33  ;;  %v784_v44 = vmax.f32 %v767_v37, 0.0  ;;  %v1447_v40 = vmov 6  }
 0x334   : > { %v785_v43 = vmax.f32 %v769_v39, 0.0  ;;  %v1404_v39 = vld [vmem:[%s1656_s3 + $0x38] sm:$0xff]   ;;  %1391 = vset.pattern.permute.xlu1 %v1447_v40 }
 0x335   : > { %v786_v46 = vmax.f32 %v771_v41, 0.0  ;;  %v1448_v41 = vmov 5   ;;  %1051 = vperm.xlu1 %1391, %v1539_v11  }
 0x336   : > { %v791_v47 = vpack.c.bf16 %v785_v43, %v783_v42  ;;  %1392 = vset.pattern.permute.xlu0 %v1448_v41  ;;  %v904_v42 = vpop.permute.xlu0 %903  ;;  %v908_v43 = vpop.permute.xlu1 %907 }
 0x337   : > { %v792_v48 = vpack.c.bf16 %v786_v46, %v784_v44  ;;  %v774_v49 = vpop.f32.mrb[12].mxu1  ;;  %1045 = vperm.xlu0 %1392, %v1539_v11  }
 0x338   : > { %v775_v50 = vadd.f32 %v774_v49, %v708_v45  ;;  %v776_v51 = vpop.f32.mrb[13].mxu1 }
 0x339   : > { %v777_v53 = vadd.f32 %v776_v51, %v708_v45  ;;  %v778_v54 = vpop.f32.mrb[14].mxu1  ;;  %832 = vmatprep.subr.bf16.mxu0 %v792_v48 }
 0x33a   : > { %v779_v55 = vadd.f32 %v778_v54, %v712_v52  ;;  %v780_v56 = vpop.f32.mrb[15].mxu1  ;;  %833 = vmatpush1.bf16.msra.mxu0 %v791_v47  ;;  %v787_v58 = vmax.f32 %v775_v50, 0.0  ;;  %v912_v54 = vpop.permute.xlu1 %911 }
 0x33b   : > { %v781_v57 = vadd.f32 %v780_v56, %v712_v52  ;;  %v788_v60 = vmax.f32 %v777_v53, 0.0  ;;  %1393 = vset.pattern.permute.xlu0 %v1447_v40 }
 0x33c   : > { %v789_v59 = vmax.f32 %v779_v55, 0.0 }
 0x33d   : > { %v790_v61 = vmax.f32 %v781_v57, 0.0 }
 0x33e   : > { %v793_v62 = vpack.c.bf16 %v789_v59, %v787_v58 }
 0x33f   : > { %v794_v63 = vpack.c.bf16 %v790_v61, %v788_v60  ;;  %v916_v60 = vpop.permute.xlu0 %915 }
 0x341   : > { %834 = vmatprep.subr.bf16.mxu0 %v794_v63 }
 0x342   : > { %835 = vmatpush1.bf16.msra.mxu0 %v793_v62 }
 0x345   : > { %1322 = vmatmul.mubr.msk.bf16.vlgmr.msra.gmra.mrb[8].mxu0 %vm621_vm2, %v1401_v0 }
 0x346   : > { %874 = vmatprep.mubr.bf16.mxu0 %v1442_v2 }
 0x34d   : > { %1323 = vmatmul.mubr.msk.bf16.gmra.mrb[12].mxu0 %vm621_vm2, %v1402_v1 }
 0x34e   : > { %1035 = vmatprep.mubr.bf16.mxu0 %v1442_v2 }
 0x418   : > { %v866_v5 = vpop.f32.mrb[8].mxu0 }
 0x419   : > { %v867_v8 = vadd.f32 %v866_v5, %v802_v4  ;;  %v868_v9 = vpop.f32.mrb[9].mxu0 }
 0x41a   : > { %v869_v10 = vadd.f32 %v868_v9, %v802_v4  ;;  %v870_v15 = vpop.f32.mrb[10].mxu0 }
 0x41b   : > { %v871_v16 = vadd.f32 %v870_v15, %v806_v7  ;;  %v872_v17 = vpop.f32.mrb[11].mxu0  ;;  %v885_v20 = vmax.f32 %v867_v8, 0.0  ;;  %v1052_v15 = vpop.permute.xlu1 %1051 }
 0x41c   : > { %v873_v19 = vadd.f32 %v872_v17, %v806_v7  ;;  %v886_v22 = vmax.f32 %v869_v10, 0.0  ;;  %v999_v10 = vld [vmem:[%s1657_s4] sm:$0x3]  ;;  %v1046_v17 = vpop.permute.xlu0 %1045 }
 0x41d   : > { %v887_v21 = vmax.f32 %v871_v16, 0.0  ;;  %v1053_v16 = vrot.slane %v1052_v15, 6 }
 0x41e   : > { %v888_v23 = vmax.f32 %v873_v19, 0.0 }
 0x41f   : > { %v893_v13 = vpack.c.bf16 %v887_v21, %v885_v20 }
 0x420   : > { %v894_v24 = vpack.c.bf16 %v888_v23, %v886_v22  ;;  %v876_v14 = vpop.f32.mrb[12].mxu0 }
 0x421   : > { %v877_v25 = vadd.f32 %v876_v14, %v810_v18  ;;  %v878_v12 = vpop.f32.mrb[13].mxu0 }
 0x422   : > { %v879_v27 = vadd.f32 %v878_v12, %v810_v18  ;;  %v880_v28 = vpop.f32.mrb[14].mxu0  ;;  %934 = vmatprep.subr.bf16.mxu1 %v894_v24 }
 0x423   : > { %v881_v29 = vadd.f32 %v880_v28, %v814_v26  ;;  %v882_v30 = vpop.f32.mrb[15].mxu0  ;;  %935 = vmatpush1.bf16.msra.mxu1 %v893_v13  ;;  %v889_v32 = vmax.f32 %v877_v25, 0.0 }
 0x424   : > { %v883_v31 = vadd.f32 %v882_v30, %v814_v26  ;;  %v890_v34 = vmax.f32 %v879_v27, 0.0 }
 0x425   : > { %v891_v33 = vmax.f32 %v881_v29, 0.0 }
 0x426   : > { %v892_v35 = vmax.f32 %v883_v31, 0.0 }
 0x427   : > { %v895_v36 = vpack.c.bf16 %v891_v33, %v889_v32 }
 0x428   : > { %v896_v37 = vpack.c.bf16 %v892_v35, %v890_v34 }
 0x42a   : > { %936 = vmatprep.subr.bf16.mxu1 %v896_v37 }
 0x42b   : > { %937 = vmatpush1.bf16.msra.mxu1 %v895_v36 }
 0x42e   : > { %1330 = vmatmul.mubr.msk.bf16.vlgmr.msra.gmra.mrb[16].mxu1 %vm621_vm2, %v1403_v38 }
 0x42f   : > { %976 = vmatprep.mubr.bf16.mxu1 %v1442_v2 }
 0x436   : > { %1331 = vmatmul.mubr.msk.bf16.gmra.mrb[20].mxu1 %vm621_vm2, %v1404_v39 }
 0x501   : > { %v968_v44 = vpop.f32.mrb[16].mxu1 }
 0x502   : > { %v969_v45 = vadd.f32 %v968_v44, %v904_v42  ;;  %v970_v2 = vpop.f32.mrb[17].mxu1 }
 0x503   : > { %v971_v46 = vadd.f32 %v970_v2, %v904_v42  ;;  %v972_v47 = vpop.f32.mrb[18].mxu1 }
 0x504   : > { %v973_v48 = vadd.f32 %v972_v47, %v908_v43  ;;  %v974_v49 = vpop.f32.mrb[19].mxu1  ;;  %v987_v51 = vmax.f32 %v969_v45, 0.0 }
 0x505   : > { %v975_v50 = vadd.f32 %v974_v49, %v908_v43  ;;  %v988_v53 = vmax.f32 %v971_v46, 0.0 }
 0x506   : > { %v989_v52 = vmax.f32 %v973_v48, 0.0 }
 0x507   : > { %v990_v55 = vmax.f32 %v975_v50, 0.0 }
 0x508   : > { %v995_v56 = vpack.c.bf16 %v989_v52, %v987_v51  ;;  %v1449_v51 = vmov 1966171168  }
 0x509   : > { %v996_v57 = vpack.c.bf16 %v990_v55, %v988_v53  ;;  %v978_v58 = vpop.f32.mrb[20].mxu1  ;;  %v1115_v52 = vunpack.c.l.s4 %v1449_v51 }
 0x50a   : > { %v979_v11 = vadd.f32 %v978_v58, %v912_v54  ;;  %v980_v59 = vpop.f32.mrb[21].mxu1 }
 0x50b   : > { %v981_v61 = vadd.f32 %v980_v59, %v912_v54  ;;  %v982_v62 = vpop.f32.mrb[22].mxu1  ;;  %1003 = vmatprep.subr.bf16.mxu0 %v996_v57  ;;  %v1116_v57 = vunpack.c.0.s8 %v1115_v52 }
 0x50c   : > { %v983_v63 = vadd.f32 %v982_v62, %v916_v60  ;;  %v984_v0 = vpop.f32.mrb[23].mxu1  ;;  %1004 = vmatpush1.bf16.msra.mxu0 %v995_v56  ;;  %v991_v3 = vmax.f32 %v979_v11, 0.0 }
 0x50d   : > { %v985_v1 = vadd.f32 %v984_v0, %v916_v60  ;;  %v992_v5 = vmax.f32 %v981_v61, 0.0 }
 0x50e   : > { %v993_v4 = vmax.f32 %v983_v63, 0.0 }
 0x50f   : > { %v994_v7 = vmax.f32 %v985_v1, 0.0 }
 0x510   : > { %v997_v8 = vpack.c.bf16 %v993_v4, %v991_v3 }
 0x511   : > { %v998_v9 = vpack.c.bf16 %v994_v7, %v992_v5 }
 0x513   : > { %1005 = vmatprep.subr.bf16.mxu0 %v998_v9 }
 0x514   : > { %1006 = vmatpush1.bf16.msra.mxu0 %v997_v8 }
 0x517   : > { %1332 = vmatmul.mubr.msk.bf16.vlgmr.msra.gmra.mrb[16].mxu0 %vm621_vm2, %v999_v10 }
 0x5ea   : > { %v1037_v18 = vpop.f32.mrb[16].mxu0 }
 0x5eb   : > { %v1055_v19 = vadd.f32 %v1053_v16, %v1037_v18  ;;  %v1039_v20 = vpop.f32.mrb[17].mxu0  ;;  %v1048_v21 = vadd.f32 %v1046_v17, %v1037_v18 }
 0x5ec   : > { %v1056_v22 = vadd.f32 %v1053_v16, %v1039_v20  ;;  %v1041_v23 = vpop.f32.mrb[18].mxu0  ;;  %v1049_v13 = vadd.f32 %v1046_v17, %v1039_v20 }
 0x5ed   : > { %v1057_v24 = vadd.f32 2.0, %v1055_v19  ;;  %v1042_v14 = vpop.f32.mrb[19].mxu0 }
 0x5ee   : > { %v1058_v25 = vadd.f32 2.0, %v1056_v22  ;;  %v1075_v12 = vcombine.low %v1048_v21, %v1049_v13 }
 0x5ef   : > { %v1333_v26 = vmul.f32 -1.442695, %v1057_v24 }
 0x5f0   : > { %v1334_v27 = vmul.f32 -1.442695, %v1058_v25  ;;  %v1076_v33 = vrot.slane %v1075_v12, 6 }
 0x5f1   : > { %1405 = vpow2.f32 %v1333_v26 }
 0x5f2   : > { %1407 = vpow2.f32 %v1334_v27  ;;  %v1078_v37 = vadd.f32 %v1076_v33, %v1530_v6  ;;  %v1117_v6 = vlaneseq }
 0x5f4   : > { %v1118_v58 = vshrl.u32 %v1117_v6, 7  ;;  %vm1131_vm4 = vcmp.lt.s32.totalorder %v1117_v6, 256 }
 0x5f6   : > { %v1119_v62 = vsub.s32 %v1116_v57, %v1118_v58 }
 0x5fb   : > { %v1406_v28 = vpop.eup %1405 }
 0x5fc   : > { %v1408_v29 = vpop.eup %1407  ;;  %v1065_v30 = vadd.f32 1.0, %v1406_v28 }
 0x5fd   : > { %v1066_v31 = vadd.f32 1.0, %v1408_v29 }
 0x5fe   : > { %1409 = vrcp.f32 %v1065_v30 }
 0x5ff   : > { %1411 = vrcp.f32 %v1066_v31 }
 0x608   : > { %v1410_v32 = vpop.eup %1409 }
 0x609   : > { %v1412_v34 = vpop.eup %1411  ;;  %v1071_v35 = vadd.f32 0.0001, %v1410_v32 }
 0x60a   : > { %v1072_v36 = vadd.f32 0.0001, %v1412_v34 }
 0x60b   : > { %1413 = vlog2.f32 %v1071_v35 }
 0x60c   : > { %1415 = vlog2.f32 %v1072_v36  ;;  %v1081_v38 = vcombine.low %v1071_v35, %v1072_v36 }
 0x60e   : > { %v1083_v39 = vmul.f32 %v1081_v38, %v1078_v37 }
 0x610   : > { %1085 = vst [vmem:[%s1634_s9] sm:$0xcc] %v1083_v39 }
 0x615   : > { %v1414_v40 = vpop.eup %1413 }
 0x616   : > { %v1416_v41 = vpop.eup %1415  ;;  %v1087_v42 = vmul.f32 0.6931472, %v1414_v40 }
 0x617   : > { %v1089_v43 = vmul.f32 0.6931472, %v1416_v41 }
 0x618   : > { %v1092_v44 = vrot.slane %v1087_v42, 2 }
 0x619   : > { %v1093_v45 = vrot.slane %v1089_v43, 2 }
 0x61a   : > { %v1097_v2 = vsel %vm1096_vm3, %v1092_v44, 0.0 }
 0x61b   : > { %v1098_v46 = vrot.slane %v1097_v2, 4  ;;  %v1104_v47 = vsel %vm1096_vm3, %v1093_v45, 0.0 }
 0x61c   : > { %v1105_v48 = vrot.slane %v1104_v47, 4 }
 0x61d   : > { %v1099_v49 = vadd.f32 %v1098_v46, %v1097_v2 }
 0x61e   : > { %v1106_v50 = vadd.f32 %v1105_v48, %v1104_v47 }
 0x61f   : > { %v1100_v53 = vrot.slane %v1099_v49, 2 }
 0x620   : > { %v1107_v54 = vrot.slane %v1106_v50, 2 }
 0x621   : > { %v1101_v55 = vadd.f32 %v1100_v53, %v1099_v49 }
 0x622   : > { %v1108_v56 = vadd.f32 %v1107_v54, %v1106_v50 }
 0x623   : > { %v1102_v11 = vrot.slane %v1101_v55, 1 }
 0x624   : > { %v1109_v59 = vrot.slane %v1108_v56, 1 }
 0x625   : > { %v1103_v60 = vadd.f32 %v1102_v11, %v1101_v55 }
 0x626   : > { %v1110_v61 = vadd.f32 %v1109_v59, %v1108_v56 }
 0x628   : > { %v1113_v63 = vcombine.low %v1103_v60, %v1110_v61 }
 0x62a   : > { %v1120_v0 = vrot.slane %v1113_v63, %v1119_v62 }
 0x62c   : > { %v1127_v1 = vrot.slane %v1120_v0, %v1119_v62 }
 0x62e   : > { %1133 = vst.msk [vmem:[%s374_s13] sm:$0x3] %vm1131_vm4, %v1127_v1 }
 0x62f PF: > { %s18_s26 = sadd.s32 1, %s1439_s26   ;;  %s1661_s24 = smov %s1435_s25 }
 0x630   : > { %p15_p5 = scmp.ge.s32.totalorder %s18_s26, 4   ;;  %s1662_s25 = smov %s1664_s27 }
 0x632   :  { %17 = sbr.rel (!%p15_p5) target bundleno = 2 (0x2), region = 92 }

</bundles_post_ra>
